<compile_context>
chip_gen: v7x
topology: tpu7x:2x2x1
jax: 0.10.0
libtpu: 0.0.40
codegen_flags: <defaults>
</compile_context>

<pallas_src>
import functools

import jax
import jax.numpy as jnp
from jax.experimental import pallas as pl
from jax.experimental.pallas import tpu as pltpu

EPS = 1e-5
NEG_BIG = -1e30


def _round_up(n, m):
    return ((n + m - 1) // m) * m


# ------------------------------- kernels -----------------------------------


def sage_layer_kernel(a_ref, dinv_ref, xf_ref, xr_ref, w_ref, b_ref, h_ref):
    """One SAGEConv layer (mean aggregation) with BN/bias folded into w/b, relu epilogue.

    a_ref   : (TM, NP)   bf16  0/1 adjacency rows (edge counts) for this node tile
    dinv_ref: (TM, 1)    f32   1 / in-degree for this node tile
    xf_ref  : (NP, FP)   bf16  full node features (VMEM-resident across the grid)
    xr_ref  : (TM, FP)   bf16  this tile's rows of the node features (self term)
    w_ref   : (2FP, HP)  bf16  fused [Wl; Wr] with the BN scale folded in
    b_ref   : (1, HP)    f32   fused bias (conv bias + BN shift)
    h_ref   : (TM, HP)   bf16  output activations
    """
    agg = jnp.dot(a_ref[...], xf_ref[...], preferred_element_type=jnp.float32)
    agg = agg * dinv_ref[...]                                 # mean aggregation in f32
    cat = jnp.concatenate([agg.astype(jnp.bfloat16), xr_ref[...]], axis=1)
    h = jnp.dot(cat, w_ref[...], preferred_element_type=jnp.float32) + b_ref[...]
    h_ref[...] = jnp.maximum(h, 0.0).astype(h_ref.dtype)


def sage_layer_head_kernel(a_ref, dinv_ref, hf_ref, hr_ref, w_ref, b_ref,
                           wlin_ref, blin_ref, logp_ref, out_ref, *, num_classes):
    """Second SAGEConv layer fused with the Linear head, relu and log_softmax."""
    agg = jnp.dot(a_ref[...], hf_ref[...], preferred_element_type=jnp.float32)
    agg = agg * dinv_ref[...]
    cat = jnp.concatenate([agg.astype(jnp.bfloat16), hr_ref[...]], axis=1)
    h2 = jnp.dot(cat, w_ref[...], preferred_element_type=jnp.float32) + b_ref[...]
    h2 = jnp.maximum(h2, 0.0)

    out = jnp.dot(h2.astype(jnp.bfloat16), wlin_ref[...],
                  preferred_element_type=jnp.float32) + blin_ref[...]
    out = jnp.maximum(out, 0.0)

    # log_softmax over the (lane-dense, padded) class dimension; padded lanes masked out.
    lane = jax.lax.broadcasted_iota(jnp.int32, out.shape, 1)
    masked = jnp.where(lane < num_classes, out, NEG_BIG)
    mx = jnp.max(masked, axis=1, keepdims=True)
    shifted = masked - mx
    lse = jnp.log(jnp.sum(jnp.exp(shifted), axis=1, keepdims=True))
    logp_ref[...] = shifted - lse
    out_ref[...] = out


# --------------------------- host-side preparation --------------------------


def fold_bn(w_l, b_l, w_r, gamma, beta, mean, var):
    """Fold inference BatchNorm + conv bias into the projection weights."""
    s = gamma * jax.lax.rsqrt(var + EPS)          # (1, H)
    return w_l * s, w_r * s, b_l * s + beta - mean * s


def _pad2(x, rows, cols, value=0.0):
    return jnp.pad(x, ((0, rows - x.shape[0]), (0, cols - x.shape[1])),
                   constant_values=value)


def prepare_inputs(a01, x, tm):
    n = x.shape[0]
    np_ = _round_up(n, max(tm, 128))
    fp = _round_up(x.shape[1], 128)
    deg = jnp.sum(a01, axis=1, keepdims=True)
    dinv = 1.0 / jnp.maximum(deg, 1.0)
    a_p = _pad2(a01, np_, np_).astype(jnp.bfloat16)           # 0/1 counts are exact in bf16
    dinv_p = _pad2(dinv, np_, 1, value=1.0).astype(jnp.float32)
    x_p = _pad2(x, np_, fp).astype(jnp.bfloat16)
    return a_p, dinv_p, x_p


def prepare_params(p):
    f, h = p["wl1"].shape
    c = p["wlin"].shape[1]
    fp, hp, cp = _round_up(f, 128), _round_up(h, 128), _round_up(c, 128)

    wl1, wr1, b1 = fold_bn(p["wl1"], p["bl1"], p["wr1"], p["g1"], p["be1"], p["m1"], p["v1"])
    wl2, wr2, b2 = fold_bn(p["wl2"], p["bl2"], p["wr2"], p["g2"], p["be2"], p["m2"], p["v2"])

    wcat1 = jnp.concatenate([_pad2(wl1, fp, hp), _pad2(wr1, fp, hp)], axis=0)
    wcat2 = jnp.concatenate([_pad2(wl2, hp, hp), _pad2(wr2, hp, hp)], axis=0)
    return {
        "wcat1": wcat1.astype(jnp.bfloat16), "b1": _pad2(b1, 1, hp).astype(jnp.float32),
        "wcat2": wcat2.astype(jnp.bfloat16), "b2": _pad2(b2, 1, hp).astype(jnp.float32),
        "wlin": _pad2(p["wlin"], hp, cp).astype(jnp.bfloat16),
        "blin": _pad2(p["blin"], 1, cp).astype(jnp.float32),
    }


def _vmem_limit_bytes(tm, np_, fp, hp, cp):
    bf, f32 = 2, 4
    big = max(fp, hp)
    est = (2 * tm * np_ * bf            # A tile (double-buffered)
           + 2 * tm * f32               # 1/deg tile
           + 2 * np_ * big * bf         # resident features
           + 2 * tm * big * bf          # feature rows (self term)
           + 2 * 2 * big * hp * bf      # fused layer weights
           + 2 * hp * f32               # fused bias
           + 2 * hp * cp * bf + 2 * cp * f32   # head weights / bias
           + 2 * tm * hp * bf           # h1 output tile
           + 2 * 2 * tm * cp * f32)     # logp / out tiles
    return int(min(max(2 * est, 16 * 2 ** 20), 64 * 2 ** 20))


# ------------------------------- forward ------------------------------------


def graphsage_forward(a01, x, params, *, tm=128):
    """a01: dense [N, N] adjacency counts (a01[i, j] = #edges j->i); x: [N, F] features.

    tm must be a multiple of 128 (e.g. 128 on v5e, 256 on v7x, 512 on v6e for large N).
    """
    n, c = x.shape[0], params["wlin"].shape[1]
    a_p, dinv_p, x_p = prepare_inputs(a01, x, tm)
    pp = prepare_params(params)

    np_, fp = a_p.shape[0], x_p.shape[1]
    hp, cp = pp["b1"].shape[1], pp["blin"].shape[1]
    grid = (np_ // tm,)
    cparams = pltpu.CompilerParams(
        dimension_semantics=("parallel",),
        vmem_limit_bytes=_vmem_limit_bytes(tm, np_, fp, hp, cp),
    )

    def row_spec(blk_cols):
        return pl.BlockSpec((tm, blk_cols), lambda i: (i, 0))

    def full_spec(shape):
        nd = len(shape)
        return pl.BlockSpec(shape, lambda i: (0,) * nd)

    # ---- layer 1: h1 for all nodes (needed in full for layer 2's aggregation) ----
    h1 = pl.pallas_call(
        sage_layer_kernel,
        out_shape=jax.ShapeDtypeStruct((np_, hp), jnp.bfloat16),
        grid=grid,
        in_specs=[row_spec(np_), row_spec(1), full_spec((np_, fp)), row_spec(fp),
                  full_spec((2 * fp, hp)), full_spec((1, hp))],
        out_specs=row_spec(hp),
        compiler_params=cparams,
    )(a_p, dinv_p, x_p, x_p, pp["wcat1"], pp["b1"])

    # ---- layer 2 + Linear head + relu + log_softmax ----
    logp_p, out_p = pl.pallas_call(
        functools.partial(sage_layer_head_kernel, num_classes=c),
        out_shape=(jax.ShapeDtypeStruct((np_, cp), jnp.float32),
                   jax.ShapeDtypeStruct((np_, cp), jnp.float32)),
        grid=grid,
        in_specs=[row_spec(np_), row_spec(1), full_spec((np_, hp)), row_spec(hp),
                  full_spec((2 * hp, hp)), full_spec((1, hp)),
                  full_spec((hp, cp)), full_spec((1, cp))],
        out_specs=(row_spec(cp), row_spec(cp)),
        compiler_params=cparams,
    )(a_p, dinv_p, h1, h1, pp["wcat2"], pp["b2"], pp["wlin"], pp["blin"])

    return logp_p[:n, :c], out_p[:n, :c]


# ------------------------------ references ----------------------------------


def matched_reference(a01, x, params, *, tm=128):
    """Pure-JAX forward that mirrors the kernel's precision (bf16 MXU operands, f32 acc)."""
    n, c = x.shape[0], params["wlin"].shape[1]
    a_p, dinv_p, x_p = prepare_inputs(a01, x, tm)
    pp = prepare_params(params)
    cp = pp["blin"].shape[1]

    def layer(feat_bf, wcat, b):
        agg = jnp.dot(a_p, feat_bf, preferred_element_type=jnp.float32) * dinv_p
        cat = jnp.concatenate([agg.astype(jnp.bfloat16), feat_bf], axis=1)
        return jnp.maximum(jnp.dot(cat, wcat, preferred_element_type=jnp.float32) + b, 0.0)

    h1 = layer(x_p, pp["wcat1"], pp["b1"]).astype(jnp.bfloat16)
    h2 = layer(h1, pp["wcat2"], pp["b2"])
    out = jnp.maximum(
        jnp.dot(h2.astype(jnp.bfloat16), pp["wlin"], preferred_element_type=jnp.float32)
        + pp["blin"], 0.0)
    lane = jnp.arange(cp)[None, :]
    masked = jnp.where(lane < c, out, NEG_BIG)
    mx = jnp.max(masked, axis=1, keepdims=True)
    shifted = masked - mx
    logp = shifted - jnp.log(jnp.sum(jnp.exp(shifted), axis=1, keepdims=True))
    return logp[:n, :c], out[:n, :c]


def _bn(x, gamma, beta, mean, var):
    return (x - mean) * jax.lax.rsqrt(var + EPS) * gamma + beta


def module_reference(a01, x, p):
    """Full-f32 reference matching the PyTorch module (eval mode, n_layers=2)."""
    deg = jnp.sum(a01, axis=1, keepdims=True)
    a_norm = a01 / jnp.maximum(deg, 1.0)
    h1 = a_norm @ x @ p["wl1"] + p["bl1"] + x @ p["wr1"]
    h1 = jnp.maximum(_bn(h1, p["g1"], p["be1"], p["m1"], p["v1"]), 0.0)
    h2 = a_norm @ h1 @ p["wl2"] + p["bl2"] + h1 @ p["wr2"]
    h2 = jnp.maximum(_bn(h2, p["g2"], p["be2"], p["m2"], p["v2"]), 0.0)
    out = jnp.maximum(h2 @ p["wlin"] + p["blin"], 0.0)
    return jax.nn.log_softmax(out, axis=1), out


# ------------------------------ test setup -----------------------------------


def build_adjacency_counts(edge_index, num_nodes):
    # edge_index: [2, E], row 0 = source, row 1 = target (messages flow src -> dst).
    src, dst = edge_index[0], edge_index[1]
    return jnp.zeros((num_nodes, num_nodes), jnp.float32).at[dst, src].add(1.0)


def init_params(key, num_features, hidden, num_classes):
    ks = jax.random.split(key, 12)

    def glorot(k, shape):
        fan_in, fan_out = shape
        lim = (6.0 / (fan_in + fan_out)) ** 0.5
        return jax.random.uniform(k, shape, jnp.float32, -lim, lim)

    return {
        # SAGEConv 1 (weights stored [in, out] so the kernel computes x @ W)
        "wl1": glorot(ks[0], (num_features, hidden)),
        "bl1": 0.05 * jax.random.normal(ks[1], (1, hidden), jnp.float32),
        "wr1": glorot(ks[2], (num_features, hidden)),
        # BN 1 (running stats perturbed so the BN fold is non-trivial)
        "g1": 1.0 + 0.1 * jax.random.normal(ks[3], (1, hidden), jnp.float32),
        "be1": 0.05 * jax.random.normal(ks[4], (1, hidden), jnp.float32),
        "m1": 0.1 * jax.random.normal(ks[5], (1, hidden), jnp.float32),
        "v1": 1.0 + 0.1 * jax.random.uniform(ks[6], (1, hidden), jnp.float32),
        # SAGEConv 2
        "wl2": glorot(ks[7], (hidden, hidden)),
        "bl2": 0.05 * jax.random.normal(ks[8], (1, hidden), jnp.float32),
        "wr2": glorot(ks[9], (hidden, hidden)),
        # BN 2
        "g2": jnp.ones((1, hidden), jnp.float32),
        "be2": jnp.zeros((1, hidden), jnp.float32),
        "m2": jnp.zeros((1, hidden), jnp.float32),
        "v2": jnp.ones((1, hidden), jnp.float32),
        # Linear(hidden, num_classes)
        "wlin": glorot(ks[10], (hidden, num_classes)),
        "blin": 0.05 * jax.random.normal(ks[11], (1, num_classes), jnp.float32),
    }


if __name__ == "__main__":
    key = jax.random.PRNGKey(0)
    N, F, H, C, E = 200, 96, 64, 10, 800   # nodes, features, hidden, classes, edges

    k_x, k_e, k_p = jax.random.split(key, 3)
    x = jax.random.normal(k_x, (N, F), jnp.float32)
    edge_index = jax.random.randint(k_e, (2, E), 0, N, jnp.int32)
    a01 = build_adjacency_counts(edge_index, N)
    params = init_params(k_p, F, H, C)

    logp, out = graphsage_forward(a01, x, params, tm=128)
    jax.block_until_ready((logp, out))

    # 1) precision-matched reference (same bf16 casts / fused form) -> tight tolerance
    logp_m, out_m = matched_reference(a01, x, params, tm=128)
    assert jnp.allclose(out, out_m, atol=2e-3, rtol=2e-3), float(jnp.max(jnp.abs(out - out_m)))
    assert jnp.allclose(logp, logp_m, atol=2e-3, rtol=2e-3), float(jnp.max(jnp.abs(logp - logp_m)))

    # 2) full-f32 module reference (explicit BN, un-fused) -> bf16-level tolerance
    logp_f, out_f = module_reference(a01, x, params)
    assert jnp.allclose(out, out_f, atol=0.15, rtol=0.1), float(jnp.max(jnp.abs(out - out_f)))
    assert jnp.allclose(logp, logp_f, atol=0.15, rtol=0.1), float(jnp.max(jnp.abs(logp - logp_f)))

    print("KERNEL_OK")
</pallas_src>

<mosaic_0001>
module attributes {stable_mosaic.version = 11 : i64} {
  func.func @sage_layer_kernel(%arg0: i32, %arg1: memref<128x256xbf16, #tpu.memory_space<vmem>>, %arg2: memref<128x1xf32, #tpu.memory_space<vmem>>, %arg3: memref<256x128xbf16, #tpu.memory_space<vmem>>, %arg4: memref<128x128xbf16, #tpu.memory_space<vmem>>, %arg5: memref<256x128xbf16, #tpu.memory_space<vmem>>, %arg6: memref<1x128xf32, #tpu.memory_space<vmem>>, %arg7: memref<128x128xbf16, #tpu.memory_space<vmem>>) attributes {dimension_semantics = [#tpu.dimension_semantics<parallel>], iteration_bounds = array<i64: 2>, scalar_prefetch = 0 : i64, scratch_operands = 0 : i64, tpu.core_type = #tpu.core_type<tc>, window_params = [{transform_indices = @transform_0, window_bounds = array<i64: 128, 256>}, {transform_indices = @transform_1, window_bounds = array<i64: 128, 1>}, {pipeline_mode = #tpu.pipeline_mode<synchronous>, transform_indices = @transform_2, window_bounds = array<i64: 256, 128>}, {transform_indices = @transform_3, window_bounds = array<i64: 128, 128>}, {pipeline_mode = #tpu.pipeline_mode<synchronous>, transform_indices = @transform_4, window_bounds = array<i64: 256, 128>}, {pipeline_mode = #tpu.pipeline_mode<synchronous>, transform_indices = @transform_5, window_bounds = array<i64: 1, 128>}, {transform_indices = @transform_6, window_bounds = array<i64: 128, 128>}]} {
    %c0 = arith.constant 0 : index
    %c0_0 = arith.constant 0 : index
    %0 = vector.load %arg1[%c0, %c0_0] : memref<128x256xbf16, #tpu.memory_space<vmem>>, vector<128x256xbf16>
    %c0_1 = arith.constant 0 : index
    %c0_2 = arith.constant 0 : index
    %1 = vector.load %arg3[%c0_1, %c0_2] : memref<256x128xbf16, #tpu.memory_space<vmem>>, vector<256x128xbf16>
    %cst = arith.constant dense<0.000000e+00> : vector<128x128xf32>
    %2 = tpu.matmul %0, %1, %cst {dimension_numbers = #tpu.dot_dimension_numbers<[1], [0], [0], [1], [0, 0, 1, 1], [], []>} : vector<128x256xbf16>, vector<256x128xbf16>, vector<128x128xf32> -> vector<128x128xf32>
    %c0_3 = arith.constant 0 : index
    %c0_4 = arith.constant 0 : index
    %3 = vector.load %arg2[%c0_3, %c0_4] : memref<128x1xf32, #tpu.memory_space<vmem>>, vector<128x1xf32>
    %4 = vector.broadcast %3 : vector<128x1xf32> to vector<128x128xf32>
    %5 = arith.mulf %2, %4 : vector<128x128xf32>
    %6 = arith.truncf %5 : vector<128x128xf32> to vector<128x128xbf16>
    %c0_5 = arith.constant 0 : index
    %c0_6 = arith.constant 0 : index
    %7 = vector.load %arg4[%c0_5, %c0_6] : memref<128x128xbf16, #tpu.memory_space<vmem>>, vector<128x128xbf16>
    %8 = tpu.concatenate %6, %7 in 1 : vector<128x128xbf16>, vector<128x128xbf16> -> vector<128x256xbf16>
    %c0_7 = arith.constant 0 : index
    %c0_8 = arith.constant 0 : index
    %9 = vector.load %arg5[%c0_7, %c0_8] : memref<256x128xbf16, #tpu.memory_space<vmem>>, vector<256x128xbf16>
    %cst_9 = arith.constant dense<0.000000e+00> : vector<128x128xf32>
    %10 = tpu.matmul %8, %9, %cst_9 {dimension_numbers = #tpu.dot_dimension_numbers<[1], [0], [0], [1], [0, 0, 1, 1], [], []>} : vector<128x256xbf16>, vector<256x128xbf16>, vector<128x128xf32> -> vector<128x128xf32>
    %c0_10 = arith.constant 0 : index
    %c0_11 = arith.constant 0 : index
    %11 = vector.load %arg6[%c0_10, %c0_11] : memref<1x128xf32, #tpu.memory_space<vmem>>, vector<1x128xf32>
    %12 = vector.broadcast %11 : vector<1x128xf32> to vector<128x128xf32>
    %13 = arith.addf %10, %12 : vector<128x128xf32>
    %cst_12 = arith.constant 0.000000e+00 : f32
    %14 = vector.broadcast %cst_12 : f32 to vector<128x128xf32>
    %15 = arith.maximumf %13, %14 : vector<128x128xf32>
    %16 = arith.truncf %15 : vector<128x128xf32> to vector<128x128xbf16>
    %c0_13 = arith.constant 0 : index
    %c0_14 = arith.constant 0 : index
    %17 = vector.load %arg7[%c0_13, %c0_14] : memref<128x128xbf16, #tpu.memory_space<vmem>>, vector<128x128xbf16>
    tpu.vector_store %arg7[%c0_13, %c0_14], %16 {strides = array<i32>} : memref<128x128xbf16, #tpu.memory_space<vmem>>, vector<128x128xbf16>,
    return
  }
  func.func @transform_0(%arg0: i32) -> (i32, i32) {
    %c0_i32 = arith.constant 0 : i32
    %c0_i32_0 = arith.constant 0 : i32
    return %arg0, %c0_i32 : i32, i32
  }
  func.func @transform_1(%arg0: i32) -> (i32, i32) {
    %c0_i32 = arith.constant 0 : i32
    %c0_i32_0 = arith.constant 0 : i32
    return %arg0, %c0_i32 : i32, i32
  }
  func.func @transform_2(%arg0: i32) -> (i32, i32) {
    %c0_i32 = arith.constant 0 : i32
    %c0_i32_0 = arith.constant 0 : i32
    %c0_i32_1 = arith.constant 0 : i32
    return %c0_i32, %c0_i32_0 : i32, i32
  }
  func.func @transform_3(%arg0: i32) -> (i32, i32) {
    %c0_i32 = arith.constant 0 : i32
    %c0_i32_0 = arith.constant 0 : i32
    return %arg0, %c0_i32 : i32, i32
  }
  func.func @transform_4(%arg0: i32) -> (i32, i32) {
    %c0_i32 = arith.constant 0 : i32
    %c0_i32_0 = arith.constant 0 : i32
    %c0_i32_1 = arith.constant 0 : i32
    return %c0_i32, %c0_i32_0 : i32, i32
  }
  func.func @transform_5(%arg0: i32) -> (i32, i32) {
    %c0_i32 = arith.constant 0 : i32
    %c0_i32_0 = arith.constant 0 : i32
    %c0_i32_1 = arith.constant 0 : i32
    return %c0_i32, %c0_i32_0 : i32, i32
  }
  func.func @transform_6(%arg0: i32) -> (i32, i32) {
    %c0_i32 = arith.constant 0 : i32
    %c0_i32_0 = arith.constant 0 : i32
    return %arg0, %c0_i32 : i32, i32
  }
}

</mosaic_0001>

<bundles_post_ra>
// kernel: tpu_custom_call.1
= control target key start
LH: loop header
LB: loop body
LE: loop exit
PB: predicated region body
PF: predicated region fallthrough
CT: control target
= control target key end

     0   :  { %11 = vsyncpa [#allocation3], 0  ;;  %s2278_s0 = inlined_call_operand.vmem [shape: bf16[256,256], index: 0, kind: input, shape index: {}]   ;;  %s2279_s1 = inlined_call_operand.vmem [shape: f32[256,1], index: 1, kind: input, shape index: {}]   ;;  %s2280_s2 = inlined_call_operand.hbm [shape: bf16[256,128], index: 2, kind: input, shape index: {}]   ;;  %s2281_s3 = inlined_call_operand.hbm [shape: bf16[256,128], index: 3, kind: input, shape index: {}]   ;;  %s2282_s4 = inlined_call_operand.hbm [shape: bf16[256,128], index: 4, kind: input, shape index: {}]   ;;  %s2283_s5 = inlined_call_operand.vmem [shape: f32[1,128], index: 5, kind: input, shape index: {}]   ;;  %s2284_s6 = inlined_call_operand.hbm [shape: bf16[256,128], index: 6, kind: output, shape index: {}]  }
   0x1   :  { %12 = vsyncpa [#allocation6], 0 }
   0x2   :  { %14 = vsyncpa [#allocation6 + $0x1], 0 }
   0x3   :  { %15 = vsyncpa [#allocation4], 0 }
   0x4   :  { %17 = vsyncpa [#allocation4 + $0x1], 0  ;;  %s1948_s21 = smov 0   ;;  %s1950_s22 = smov 0  }
   0x5   :  { %s1952_s23 = smov 0   ;;  %s1954_s24 = smov 0  }
   0x6 LB: > { %s1969_s25 = sadd.s32 4294967295, %s1902_s24   ;;  %s1314_s26 = sadd.s32 4294967294, %s1902_s24   ;;  %s1902_s24 = sphi %s1954_s24, %s2316_s24   ;;  %s1898_s23 = sphi %s1952_s23, %s2315_s23   ;;  %s1894_s22 = sphi %s1950_s22, %s2314_s22   ;;  %s1890_s21 = sphi %s1948_s21, %s2313_s21  }
   0x7   : > { %s1973_s27 = sadd.s32 1, %s1902_s24   ;;  %s103_s28 = sadd.s32 1, %s1898_s23 }
   0x8   : > { %s100_s29 = ssub.s32 %s1902_s24, %s1973_s27  ;;  %p110_p0 = scmp.ne.s32.totalorder %s1898_s23, %s1894_s22 }
   0x9   : > { %p101_p1 = scmp.eq.s32.totalorder %s100_s29, 0  ;;  %p111_p2 = scmp.eq.s32.totalorder %s1902_s24, 0 }
   0xa   : > { %p116_p3 = scmp.ne.s32.totalorder %s1894_s22, %s1890_s21  ;;  %p2286_p4 = scmp.eq.s32.totalorder %s1969_s25, 0 }
   0xb   : > { %s1985_s30 = scalar_select %p101_p1, %s1898_s23, %s103_s28  }
   0xc   : > { %p1987_p5 = por %p111_p2, %p110_p0  ;;  %p1993_p6 = por %p2286_p4, %p116_p3 }
   0xd   : > { %2291 = sst [smem:[#allocation13_spill]] %s1985_s30  ;;  %p182_p7 = scmp.eq.s32.totalorder %s1969_s25, 1 }
   0xe   : > { %s2292_s7 = scalar_select %p1987_p5, 1, 0 }
   0xf   : > { %s2293_s8 = scalar_select %p1993_p6, 1, 0 }
  0x10   : > { %p188_p8 = scmp.eq.s32.totalorder %s1314_s26, 1  ;;  %p1315_p9 = scmp.ge.s32.totalorder %s1902_s24, 1 }
  0x11   : > { %p195_p10 = scmp.lt.s32.totalorder %s1902_s24, 3  ;;  %p2000_p11 = por %p182_p7, %p110_p0 }
  0x12   : > { %p2004_p12 = por %p188_p8, %p116_p3  ;;  %s1904_s12 = smov [#allocation7]  }
  0x13   : > { %s2294_s9 = scalar_select %p2000_p11, 1, 0 }
  0x14   : > { %s2295_s10 = scalar_select %p2004_p12, 1, 0 }
  0x15   : > { %p2008_p13 = pnand %p1315_p9, %p195_p10  ;;  %s220_s13 = sshll.u32 %s1904_s12, 4  ;;  %s221_s13 = int_to_ptr.vmem [resolvable:$true] %s220_s13 }
  0x16   : > { %s1905_s15 = smov [#allocation2]   ;;  %s1742_s19 = scalar_lea.hbm %s2282_s4, 2048 }
  0x17   : > { %s2296_s11 = scalar_select %p2008_p13, 1, 0 }
  0x18   : > { %p1616_p1 = pneg %p2008_p13  ;;  %s207_s16 = sshll.u32 %s1905_s15, 4  ;;  %s208_s16 = int_to_ptr.vmem [resolvable:$true] %s207_s16 }
  0x19   : > { %p1743_p3 = scmp.ne.s32.totalorder %s2282_s4, %s1742_s19  ;;  %p1749_p10 = scmp.lt.u32.totalorder %s1742_s19, %s2282_s4 }
  0x1a   : > { %p2017_p6 = pnand %p1616_p1, %p2286_p4 }
  0x1c   : > { %p1744_p7 = pneg %p2017_p6 }
  0x1e   : > { %p1745_p8 = pnand %p1744_p7, %p1743_p3 }
  0x20   : > { %p1746_p9 = pneg %p1745_p8 }
  0x22   : > { %p1751_p1 = pnand %p1749_p10, %p1746_p9 }
  0x24   : > { %1754 = shalt.err (!%p1751_p1)
}
  0x25   : > { %s1755_s12 = scalar_lea.vmem %s221_s13, 2048  ;;  %p1763_p12 = scmp.lt.s32.totalorder %s221_s13, %s221_s13 }
  0x26   : > { %p1756_p2 = scmp.ne.s32.totalorder %s221_s13, %s1755_s12  ;;  %p1764_p11 = scmp.lt.s32.totalorder %s1755_s12, %s1755_s12 }
  0x28   : > { %p1758_p4 = pnand %p1756_p2, %p1744_p7  ;;  %p1765_p13 = por %p1764_p11, %p1763_p12 }
  0x2a   : > { %p1759_p0 = pneg %p1758_p4 }
  0x2c   : > { %p1766_p5 = pnand %p1765_p13, %p1759_p0 }
  0x2e   : > { %1769 = shalt.err (!%p1766_p5)
}
  0x2f   : > { %s2290_s15 = smov 64   ;;  %s1907_s17 = smov 4  }
  0x30   : > { %1622 = dma.hbm_to_vmem [thread:$0]  (!%p2017_p6), %s2282_s4, 2048, %s221_s13, [#allocation6], %s2290_s15, %s2290_s15, %s1907_s17  }
  0x31   : > { %p2298_p4 = scmp.ne.s32.totalorder %s2292_s7, 0  ;;  %p2299_p2 = scmp.lt.s32.totalorder %s1902_s24, 2 }
  0x32   : > { %s1770_s29 = scalar_lea.hbm %s2280_s2, 2048 }
  0x33   : > { %p2051_p3 = pnand %p2299_p2, %p2298_p4  ;;  %p1771_p5 = scmp.ne.s32.totalorder %s2280_s2, %s1770_s29 }
  0x34   : > { %p1777_p13 = scmp.lt.u32.totalorder %s1770_s29, %s2280_s2 }
  0x35   : > { %s2300_s20 = scalar_select %p2051_p3, 1, 0 }
  0x36   : > { %p1773_p11 = pnand %p1771_p5, %p1744_p7 }
  0x38   : > { %p1774_p12 = pneg %p1773_p11 }
  0x3a   : > { %p1779_p0 = pnand %p1777_p13, %p1774_p12 }
  0x3c   : > { %1782 = shalt.err (!%p1779_p0)
}
  0x3d   : > { %s1783_s18 = scalar_lea.vmem %s208_s16, 2048  ;;  %p1791_p1 = scmp.lt.s32.totalorder %s208_s16, %s208_s16 }
  0x3e   : > { %p1784_p8 = scmp.ne.s32.totalorder %s208_s16, %s1783_s18  ;;  %p1792_p4 = scmp.lt.s32.totalorder %s1783_s18, %s1783_s18 }
  0x40   : > { %p1786_p9 = pnand %p1784_p8, %p1744_p7  ;;  %p1793_p2 = por %p1792_p4, %p1791_p1 }
  0x42   : > { %p1787_p10 = pneg %p1786_p9 }
  0x44   : > { %p1794_p3 = pnand %p1793_p2, %p1787_p10 }
  0x46   : > { %1797 = shalt.err (!%p1794_p3)
}
  0x47   : > { %1619 = dma.hbm_to_vmem [thread:$0]  (!%p2017_p6), %s2280_s2, 2048, %s208_s16, [#allocation3], %s2290_s15, %s2290_s15, %s1907_s17  }
  0x48   : > { %s256_s26 = sand.u32 1, %s1902_s24   ;;  %s258_s28 = sand.u32 1, %s1898_s23  }
  0x49   : > { %s1319_s29 = sshll.u32 %s258_s28, 6  ;;  %s1410_s12 = sshll.u32 %s1902_s24, 10 }
  0x4a   : > { %s2084_s14 = scalar_lea.hbm %s2281_s3, %s1410_s12  ;;  %s260_s18 = scalar_lea.vmem [#allocation5], %s1319_s29 }
  0x4b   : > { %s267_s30 = sshll.u32 %s260_s18, 4  ;;  %s2088_s19 = scalar_lea.sflag [#allocation6], %s256_s26  ;;  %s2086_s30 = int_to_ptr.vmem [resolvable:$true] %s267_s30 }
  0x4c   : > { %s1798_s16 = scalar_lea.hbm %s2084_s14, 1024  ;;  %p2301_p7 = scmp.ne.s32.totalorder %s2300_s20, 0 }
  0x4d   : > { %p1799_p6 = scmp.ne.s32.totalorder %s2084_s14, %s1798_s16  ;;  %s1803_s13 = scalar_lea.hbm %s2281_s3, 2048 }
  0x4e   : > { %p1800_p3 = pneg %p2301_p7  ;;  %p1804_p12 = scmp.lt.u32.totalorder %s2084_s14, %s2281_s3 }
  0x4f   : > { %p1805_p13 = scmp.lt.u32.totalorder %s1803_s13, %s1798_s16  ;;  %p1807_p8 = scmp.lt.u32.totalorder %s1798_s16, %s2084_s14 }
  0x50   : > { %p1801_p5 = pnand %p1800_p3, %p1799_p6 }
  0x51   : > { %p1806_p0 = por %p1805_p13, %p1804_p12 }
  0x52   : > { %p1802_p11 = pneg %p1801_p5 }
  0x53   : > { %p1808_p9 = por %p1807_p8, %p1806_p0 }
  0x55   : > { %p1809_p10 = pnand %p1808_p9, %p1802_p11 }
  0x57   : > { %1812 = shalt.err (!%p1809_p10)
}
  0x58   : > { %s1813_s26 = scalar_lea.vmem %s2086_s30, 1024  ;;  %s1908_s29 = smov [#allocation5]  }
  0x59   : > { %p1814_p1 = scmp.ne.s32.totalorder %s2086_s30, %s1813_s26  ;;  %s1818_s18 = sshll.u32 %s1908_s29, 4  ;;  %s1819_s18 = int_to_ptr.vmem [resolvable:$false] %s1818_s18 }
  0x5a   : > { %s1820_s15 = scalar_lea.vmem %s1819_s18, 2048  ;;  %p1821_p6 = scmp.lt.s32.totalorder %s2086_s30, %s1819_s18 }
  0x5b   : > { %p1816_p4 = pnand %p1814_p1, %p1800_p3  ;;  %p1822_p5 = scmp.lt.s32.totalorder %s1820_s15, %s1813_s26 }
  0x5d   : > { %p1817_p2 = pneg %p1816_p4  ;;  %p1823_p12 = por %p1822_p5, %p1821_p6 }
  0x5f   : > { %p1824_p13 = pnand %p1823_p12, %p1817_p2 }
  0x61   : > { %1827 = shalt.err (!%p1824_p13)
}
  0x62   : > { %s2302_s16 = smov 64   ;;  %p2303_p3 = scmp.ne.s32.totalorder %s2296_s11, 0 }
  0x63   : > { %1626 = dma.hbm_to_vmem [thread:$0]  (!%p2301_p7), %s2084_s14, 1024, %s2086_s30, %s2088_s19, %s2302_s16, %s2302_s16, %s1907_s17  }
  0x64   : > { %279 = sbr.rel (%p2303_p3) target bundleno = 665 (0x299), region = 44  ;;  %p2304_p11 = scmp.eq.s32.totalorder (!%p2303_p3), %s1969_s25, 0 }
  0x6b   : > { %1873 = dma.done.wait (%p2304_p11), [#allocation3], 2048   ;;  %p2305_p0 = pmov %p2304_p11 }
  0x6c   : > { %s285_s20 = sand.u32 1, %s1969_s25   ;;  %s287_s28 = sand.u32 1, %s1894_s22  }
  0x6d   : > { %1875 = vsyncadd (%p2305_p0), [#allocation3], 4294965248  ;;  %s2129_s12 = sshll.u32 %s287_s28, 6  ;;  %s286_s17 = scalar_lea.sflag [#allocation6], %s285_s20 }
  0x6e   : > { %s2132_s14 = scalar_lea.vmem [#allocation5], %s2129_s12  ;;  %p2306_p7 = scmp.ne.s32.totalorder %s2293_s8, 0 }
  0x70   : > { %1877 = dma.done.wait (%p2306_p7), %s286_s17, 1024  }
  0x71   : > { %1879 = vsyncadd (%p2306_p7), %s286_s17, 4294966272  ;;  %p2307_p8 = pmov %p2305_p0 }
  0x72   : > { %p2308_p9 = pmov %p2305_p0 }
  0x73   : > { %1881 = dma.done.wait (%p2307_p8), [#allocation6], 2048  }
  0x74   : > { %1883 = vsyncadd (%p2308_p9), [#allocation6], 4294965248  ;;  %v1909_v0 = vmov 0   ;;  %v1678_v1 = vld [vmem:[#allocation2 + $0x40] sm:$0xff]   ;;  %s1327_s11 = sshll.u32 %s1969_s25, 4  ;;  %v1680_v3 = vld [vmem:[#allocation2 + $0x48] sm:$0xff]  }
  0x75   : > { %1676 = vset.pattern.permute.xlu0 %v1909_v0  ;;  %1677 = vset.pattern.permute.xlu1 %v1909_v0  ;;  %v1679_v2 = vld [vmem:[#allocation2] sm:$0xff]   ;;  %v1681_v4 = vld [vmem:[#allocation2 + $0x8] sm:$0xff]   ;;  %p334_p10 = scmp.lt.s32.totalorder %s1327_s11, 31  ;;  %v1682_v5 = vld [vmem:[#allocation2 + $0x50] sm:$0xff]   ;;  %s2201_s16 = scalar_lea.vmem [#allocation8], %s2129_s12 }
  0x76   : > { %1476 = vmatprep.subr.bf16.mxu0 %v1678_v1  ;;  %v1683_v6 = vld [vmem:[#allocation2 + $0x10] sm:$0xff]   ;;  %v1684_v7 = vld [vmem:[#allocation2 + $0x58] sm:$0xff]   ;;  %v1686_v9 = vld [vmem:[#allocation2 + $0x60] sm:$0xff]   ;;  %s1428_s20 = sshll.u32 %s1969_s25, 10  ;;  %s1196_s12 = sshll.u32 %s2201_s16, 4  ;;  %s2231_s12 = int_to_ptr.vmem [resolvable:$true] %s1196_s12 }
  0x77   : > { %1477 = vmatpush3.bf16.msra.mxu0 %v1679_v2  ;;  %s2318_s11 = smov (!%p334_p10, %s1327_s11), 31  ;;  %v1685_v8 = vld [vmem:[#allocation2 + $0x18] sm:$0xff]   ;;  %v1687_v10 = vld [vmem:[#allocation2 + $0x20] sm:$0xff]   ;;  %v1688_v11 = vld [vmem:[#allocation2 + $0x68] sm:$0xff]   ;;  %s1828_s30 = scalar_lea.vmem %s2231_s12, 1024 }
  0x78   : > { %1478 = vmatprep.subr.bf16.mxu0 %v1680_v3  ;;  %s1411_s8 = sshll.u32 %s2318_s11, 3  ;;  %v1689_v13 = vld [vmem:[#allocation2 + $0x28] sm:$0xff]   ;;  %v1690_v14 = vld [vmem:[#allocation2 + $0x70] sm:$0xff]   ;;  %v1692_v16 = vld [vmem:[#allocation2 + $0x78] sm:$0xff]   ;;  %s2229_s11 = scalar_lea.hbm %s2284_s6, %s1428_s20 }
  0x79   : > { %s2146_s13 = scalar_lea.vmem %s2278_s0, %s1411_s8  ;;  %v1691_v15 = vld [vmem:[#allocation2 + $0x30] sm:$0xff]   ;;  %s2152_s29 = scalar_lea.vmem %s2279_s1, %s1411_s8  ;;  %v1693_v18 = vld [vmem:[#allocation2 + $0x38] sm:$0xff]   ;;  %v1718_v26 = vld [vmem:[#allocation7 + $0x40] sm:$0xff]  }
  0x7a   : > { %v1696_v12 = vld [vmem:[%s2146_s13 + $0x4] ss:$8 sps:$4 sm:$0xff]   ;;  %v672_v19 = vld [vmem:[%s2152_s29 + $0x10] sm:$0xff]  ;;  %v673_v21 = vld [vmem:[%s2152_s29 + $0x18] sm:$0xff]  ;;  %1540 = vmatprep.subr.bf16.mxu1 %v1718_v26  ;;  %s2236_s8 = scalar_lea.sflag [#allocation4], %s287_s28  ;;  %p1829_p1 = scmp.ne.s32.totalorder %s2231_s12, %s1828_s30 }
  0x7b   : > { %1479 = vmatpush3.bf16.msra.mxu0 %v1681_v4  ;;  %605 = vmatprep.mubr.bf16.mxu0 %v1696_v12  ;;  %v670_v17 = vld [vmem:[%s2152_s29] sm:$0xff]  ;;  %v671_v20 = vld [vmem:[%s2152_s29 + $0x8] sm:$0xff]  ;;  %v1697_v23 = vld [vmem:[%s2146_s13 + $0x14] ss:$8 sps:$4 sm:$0xff]   ;;  %p2309_p4 = scmp.ne.s32.totalorder %s2294_s9, 0  ;;  %s1910_s25 = smov [#allocation8]  }
  0x7c   : > { %1480 = vmatprep.subr.bf16.mxu0 %v1682_v5  ;;  %688 = vperm.xlu0 %1676, %v670_v17   ;;  %v1694_v22 = vld [vmem:[%s2146_s13] ss:$8 sps:$4 sm:$0xff]   ;;  %v676_v28 = vld [vmem:[%s2152_s29 + $0x30] sm:$0xff]  ;;  %v677_v30 = vld [vmem:[%s2152_s29 + $0x38] sm:$0xff]  ;;  %s1832_s19 = sshll.u32 %s1910_s25, 4  ;;  %s1833_s19 = int_to_ptr.vmem [resolvable:$false] %s1832_s19 }
  0x7d   : > { %698 = vperm.xlu1 %1677, %v672_v19   ;;  %v674_v24 = vld [vmem:[%s2152_s29 + $0x20] sm:$0xff]  ;;  %v675_v25 = vld [vmem:[%s2152_s29 + $0x28] sm:$0xff]  ;;  %v1699_v32 = vld [vmem:[%s2146_s13 + $0x10] ss:$8 sps:$4 sm:$0xff]   ;;  %p1830_p2 = pnand %p1829_p1, %p2309_p4  ;;  %p1835_p5 = scmp.lt.s32.totalorder %s2231_s12, %s1833_s19 }
  0x7e   : > { %v1719_v27 = vld [vmem:[#allocation7] sm:$0xff]   ;;  %v1720_v29 = vld [vmem:[#allocation7 + $0x48] sm:$0xff]   ;;  %v1722_v35 = vld [vmem:[#allocation7 + $0x50] sm:$0xff]  }
  0x7f   : > { %1481 = vmatpush3.bf16.msra.mxu0 %v1683_v6  ;;  %v1721_v31 = vld [vmem:[#allocation7 + $0x8] sm:$0xff]   ;;  %1541 = vmatpush3.bf16.msra.mxu1 %v1719_v27  ;;  %v678_v34 = vld [vmem:[%s2152_s29 + $0x40] sm:$0xff]  ;;  %v1723_v36 = vld [vmem:[#allocation7 + $0x10] sm:$0xff]   ;;  %p1831_p6 = pneg %p1830_p2 }
  0x80   : > { %1482 = vmatprep.subr.bf16.mxu0 %v1684_v7  ;;  %693 = vperm.xlu0 %1676, %v671_v20   ;;  %v1700_v33 = vld [vmem:[%s2146_s13 + $0x24] ss:$8 sps:$4 sm:$0xff]   ;;  %v680_v38 = vld [vmem:[%s2152_s29 + $0x50] sm:$0xff]  ;;  %v1724_v39 = vld [vmem:[#allocation7 + $0x58] sm:$0xff]  }
  0x81   : > { %703 = vperm.xlu1 %1677, %v673_v21   ;;  %1542 = vmatprep.subr.bf16.mxu1 %v1720_v29  ;;  %v679_v37 = vld [vmem:[%s2152_s29 + $0x48] sm:$0xff]  ;;  %v1725_v40 = vld [vmem:[#allocation7 + $0x18] sm:$0xff]   ;;  %v682_v44 = vld [vmem:[%s2152_s29 + $0x60] sm:$0xff] }
  0x82   : > { %v681_v41 = vld [vmem:[%s2152_s29 + $0x58] sm:$0xff]  ;;  %v1702_v42 = vld [vmem:[%s2146_s13 + $0x20] ss:$8 sps:$4 sm:$0xff]   ;;  %v684_v49 = vld [vmem:[%s2152_s29 + $0x70] sm:$0xff] }
  0x83   : > { %1483 = vmatpush3.bf16.msra.mxu0 %v1685_v8  ;;  %1543 = vmatpush3.bf16.msra.mxu1 %v1721_v31  ;;  %v1703_v43 = vld [vmem:[%s2146_s13 + $0x34] ss:$8 sps:$4 sm:$0xff]   ;;  %v1726_v45 = vld [vmem:[#allocation7 + $0x60] sm:$0xff]   ;;  %v683_v47 = vld [vmem:[%s2152_s29 + $0x68] sm:$0xff] }
  0x84   : > { %1484 = vmatprep.subr.bf16.mxu0 %v1686_v9  ;;  %708 = vperm.xlu0 %1676, %v674_v24   ;;  %v1727_v46 = vld [vmem:[#allocation7 + $0x20] sm:$0xff]   ;;  %v1728_v48 = vld [vmem:[#allocation7 + $0x68] sm:$0xff]   ;;  %v685_v51 = vld [vmem:[%s2152_s29 + $0x78] sm:$0xff] }
  0x85   : > { %713 = vperm.xlu1 %1677, %v675_v25   ;;  %1544 = vmatprep.subr.bf16.mxu1 %v1722_v35  ;;  %v1729_v50 = vld [vmem:[#allocation7 + $0x28] sm:$0xff]   ;;  %v1705_v52 = vld [vmem:[%s2146_s13 + $0x30] ss:$8 sps:$4 sm:$0xff]   ;;  %v1709_v55 = vld [vmem:[%s2146_s13 + $0x54] ss:$8 sps:$4 sm:$0xff]  }
  0x86   : > { %v1706_v53 = vld [vmem:[%s2146_s13 + $0x44] ss:$8 sps:$4 sm:$0xff]   ;;  %v1708_v54 = vld [vmem:[%s2146_s13 + $0x40] ss:$8 sps:$4 sm:$0xff]   ;;  %v1711_v56 = vld [vmem:[%s2146_s13 + $0x50] ss:$8 sps:$4 sm:$0xff]  }
  0x87   : > { %1485 = vmatpush3.bf16.msra.mxu0 %v1687_v10  ;;  %1545 = vmatpush3.bf16.msra.mxu1 %v1723_v36  ;;  %v1712_v57 = vld [vmem:[%s2146_s13 + $0x64] ss:$8 sps:$4 sm:$0xff]   ;;  %v1714_v58 = vld [vmem:[%s2146_s13 + $0x60] ss:$8 sps:$4 sm:$0xff]   ;;  %v1715_v59 = vld [vmem:[%s2146_s13 + $0x74] ss:$8 sps:$4 sm:$0xff]  }
  0x88   : > { %1486 = vmatprep.subr.bf16.mxu0 %v1688_v11  ;;  %718 = vperm.xlu0 %1676, %v676_v28   ;;  %v1717_v60 = vld [vmem:[%s2146_s13 + $0x70] ss:$8 sps:$4 sm:$0xff]   ;;  %v1734_v1 = vld [vmem:[%s2132_s14] sm:$0xff]   ;;  %s1834_s13 = scalar_lea.vmem %s1833_s19, 2048 }
  0x89   : > { %723 = vperm.xlu1 %1677, %v677_v30   ;;  %1546 = vmatprep.subr.bf16.mxu1 %v1724_v39  ;;  %v1730_v61 = vld [vmem:[#allocation7 + $0x70] sm:$0xff]   ;;  %v1732_v63 = vld [vmem:[#allocation7 + $0x78] sm:$0xff]   ;;  %p1836_p12 = scmp.lt.s32.totalorder %s1834_s13, %s1828_s30 }
  0x8a   : > { %v1731_v62 = vld [vmem:[#allocation7 + $0x30] sm:$0xff]   ;;  %v1733_v0 = vld [vmem:[#allocation7 + $0x38] sm:$0xff]   ;;  %1021 = vmatprep.mubr.bf16.mxu1 %v1734_v1 }
  0x8b   : > { %1487 = vmatpush3.bf16.msra.mxu0 %v1689_v13  ;;  %1547 = vmatpush3.bf16.msra.mxu1 %v1725_v40  ;;  %v1735_v13 = vld [vmem:[%s2132_s14 + $0x8] sm:$0xff]   ;;  %v1736_v24 = vld [vmem:[%s2132_s14 + $0x10] sm:$0xff]   ;;  %v1737_v36 = vld [vmem:[%s2132_s14 + $0x18] sm:$0xff]   ;;  %p1837_p13 = por %p1836_p12, %p1835_p5 }
  0x8c   : > { %1488 = vmatprep.subr.bf16.mxu0 %v1690_v14  ;;  %728 = vperm.xlu0 %1676, %v678_v34  }
  0x8d   : > { %733 = vperm.xlu1 %1677, %v679_v37   ;;  %1548 = vmatprep.subr.bf16.mxu1 %v1726_v45  ;;  %p1838_p3 = pnand %p1837_p13, %p1831_p6 }
  0x8f   : > { %1489 = vmatpush3.bf16.msra.mxu0 %v1691_v15  ;;  %1549 = vmatpush3.bf16.msra.mxu1 %v1727_v46 }
  0x90   : > { %1490 = vmatprep.subr.bf16.mxu0 %v1692_v16  ;;  %738 = vperm.xlu0 %1676, %v680_v38  }
  0x91   : > { %743 = vperm.xlu1 %1677, %v681_v41   ;;  %1550 = vmatprep.subr.bf16.mxu1 %v1728_v48  ;;  %v1738_v48 = vld [vmem:[%s2132_s14 + $0x20] sm:$0xff]  }
  0x93   : > { %1491 = vmatpush3.bf16.msra.mxu0 %v1693_v18  ;;  %1551 = vmatpush3.bf16.msra.mxu1 %v1729_v50 }
  0x94   : > { %748 = vperm.xlu0 %1676, %v682_v44   ;;  %1552 = vmatprep.subr.bf16.mxu1 %v1730_v61 }
  0x95   : > { %753 = vperm.xlu1 %1677, %v683_v47  }
  0x96   : > { %606 = vmatmul.mubr.bf16.vlgmr.msra.gmra.mrb[0].mxu0 %v1694_v22 }
  0x97   : > { %613 = vmatprep.mubr.bf16.mxu0 %v1697_v23  ;;  %1553 = vmatpush3.bf16.msra.mxu1 %v1731_v62 }
  0x98   : > { %758 = vperm.xlu0 %1676, %v684_v49   ;;  %1554 = vmatprep.subr.bf16.mxu1 %v1732_v63 }
  0x99   : > { %763 = vperm.xlu1 %1677, %v685_v51  }
  0x9b   : > { %1555 = vmatpush3.bf16.msra.mxu1 %v1733_v0 }
  0x9e   : > { %614 = vmatmul.mubr.bf16.gmra.mrb[4].mxu0 %v1699_v32 }
  0x9f   : > { %621 = vmatprep.mubr.bf16.mxu0 %v1700_v33 }
  0xa6   : > { %622 = vmatmul.mubr.bf16.gmra.mrb[8].mxu0 %v1702_v42 }
  0xa7   : > { %629 = vmatprep.mubr.bf16.mxu0 %v1703_v43 }
  0xae   : > { %630 = vmatmul.mubr.bf16.gmra.mrb[12].mxu0 %v1705_v52 }
  0xaf   : > { %637 = vmatprep.mubr.bf16.mxu0 %v1706_v53 }
  0xb6   : > { %638 = vmatmul.mubr.bf16.gmra.mrb[16].mxu0 %v1708_v54 }
  0xb7   : > { %645 = vmatprep.mubr.bf16.mxu0 %v1709_v55 }
  0xbe   : > { %646 = vmatmul.mubr.bf16.gmra.mrb[20].mxu0 %v1711_v56 }
  0xbf   : > { %653 = vmatprep.mubr.bf16.mxu0 %v1712_v57 }
  0xc6   : > { %654 = vmatmul.mubr.bf16.gmra.mrb[24].mxu0 %v1714_v58 }
  0xc7   : > { %661 = vmatprep.mubr.bf16.mxu0 %v1715_v59 }
  0xce   : > { %662 = vmatmul.mubr.bf16.gmra.mrb[28].mxu0 %v1717_v60  ;;  %v1739_v60 = vld [vmem:[%s2132_s14 + $0x28] sm:$0xff]  }
  0xfb   : > { %v689_v2 = vpop.permute.xlu0 %688 }
  0xfc   : > { %v699_v12 = vpop.permute.xlu1 %698 }
  0xff   : > { %v694_v9 = vpop.permute.xlu0 %693 }
 0x100   : > { %v704_v21 = vpop.permute.xlu1 %703 }
 0x103   : > { %v709_v32 = vpop.permute.xlu0 %708 }
 0x104   : > { %v714_v33 = vpop.permute.xlu1 %713 }
 0x107   : > { %v719_v44 = vpop.permute.xlu0 %718 }
 0x108   : > { %v724_v45 = vpop.permute.xlu1 %723 }
 0x10b   : > { %v729_v56 = vpop.permute.xlu0 %728 }
 0x10c   : > { %v734_v57 = vpop.permute.xlu1 %733 }
 0x169   : > { %v1492_v3 = vpop.f32.mrb[0].mxu0 }
 0x16a   : > { %v1493_v4 = vpop.f32.mrb[1].mxu0 }
 0x16b   : > { %v1494_v5 = vadd.f32 %v1493_v4, %v1492_v3  ;;  %v1495_v6 = vpop.f32.mrb[2].mxu0  ;;  %v739_v4 = vpop.permute.xlu0 %738 }
 0x16c   : > { %v1496_v7 = vpop.f32.mrb[3].mxu0 }
 0x16d   : > { %v1497_v8 = vadd.f32 %v1496_v7, %v1495_v6  ;;  %v766_v10 = vmul.f32 %v1494_v5, %v689_v2  ;;  %v744_v5 = vpop.permute.xlu1 %743 }
 0x16f   : > { %v767_v11 = vmul.f32 %v1497_v8, %v694_v9  ;;  %v1740_v8 = vld [vmem:[%s2132_s14 + $0x30] sm:$0xff]  }
 0x171   : > { %v1498_v14 = vpop.f32.mrb[4].mxu0  ;;  %v782_v15 = vpack.c.bf16 %v767_v11, %v766_v10 }
 0x172   : > { %v1499_v16 = vpop.f32.mrb[5].mxu0 }
 0x173   : > { %v1500_v17 = vadd.f32 %v1499_v16, %v1498_v14  ;;  %v1501_v18 = vpop.f32.mrb[6].mxu0  ;;  %1022 = vmatmul.mubr.bf16.vlgmr.msra.gmra.mrb[0].mxu1 %v782_v15  ;;  %v749_v16 = vpop.permute.xlu0 %748 }
 0x174   : > { %v1502_v19 = vpop.f32.mrb[7].mxu0  ;;  %1029 = vmatprep.mubr.bf16.mxu1 %v1735_v13 }
 0x175   : > { %v1503_v20 = vadd.f32 %v1502_v19, %v1501_v18  ;;  %v768_v22 = vmul.f32 %v1500_v17, %v699_v12  ;;  %v754_v17 = vpop.permute.xlu1 %753 }
 0x177   : > { %v769_v23 = vmul.f32 %v1503_v20, %v704_v21  ;;  %v1741_v20 = vld [vmem:[%s2132_s14 + $0x38] sm:$0xff]  }
 0x179   : > { %v1504_v25 = vpop.f32.mrb[8].mxu0  ;;  %v783_v26 = vpack.c.bf16 %v769_v23, %v768_v22 }
 0x17a   : > { %v1505_v27 = vpop.f32.mrb[9].mxu0 }
 0x17b   : > { %v1506_v28 = vadd.f32 %v1505_v27, %v1504_v25  ;;  %v1507_v29 = vpop.f32.mrb[10].mxu0  ;;  %1030 = vmatmul.mubr.bf16.gmra.mrb[4].mxu1 %v783_v26 }
 0x17c   : > { %v1508_v30 = vpop.f32.mrb[11].mxu0  ;;  %1037 = vmatprep.mubr.bf16.mxu1 %v1736_v24 }
 0x17d   : > { %v1509_v31 = vadd.f32 %v1508_v30, %v1507_v29  ;;  %v770_v34 = vmul.f32 %v1506_v28, %v709_v32  ;;  %v759_v28 = vpop.permute.xlu0 %758  ;;  %v764_v29 = vpop.permute.xlu1 %763 }
 0x17f   : > { %v771_v35 = vmul.f32 %v1509_v31, %v714_v33 }
 0x181   : > { %v1510_v37 = vpop.f32.mrb[12].mxu0  ;;  %v784_v38 = vpack.c.bf16 %v771_v35, %v770_v34  ;;  %v2196_v34 = vld [vmem:[%s2283_s5] ss:$0 sm:$0xff] }
 0x182   : > { %v1511_v39 = vpop.f32.mrb[13].mxu0 }
 0x183   : > { %v1512_v40 = vadd.f32 %v1511_v39, %v1510_v37  ;;  %v1513_v41 = vpop.f32.mrb[14].mxu0  ;;  %1038 = vmatmul.mubr.bf16.gmra.mrb[8].mxu1 %v784_v38 }
 0x184   : > { %v1514_v42 = vpop.f32.mrb[15].mxu0  ;;  %1045 = vmatprep.mubr.bf16.mxu1 %v1737_v36 }
 0x185   : > { %v1515_v43 = vadd.f32 %v1514_v42, %v1513_v41  ;;  %v772_v46 = vmul.f32 %v1512_v40, %v719_v44 }
 0x187   : > { %v773_v47 = vmul.f32 %v1515_v43, %v724_v45 }
 0x189   : > { %v1516_v49 = vpop.f32.mrb[16].mxu0  ;;  %v785_v50 = vpack.c.bf16 %v773_v47, %v772_v46 }
 0x18a   : > { %v1517_v51 = vpop.f32.mrb[17].mxu0 }
 0x18b   : > { %v1518_v52 = vadd.f32 %v1517_v51, %v1516_v49  ;;  %v1519_v53 = vpop.f32.mrb[18].mxu0  ;;  %1046 = vmatmul.mubr.bf16.gmra.mrb[12].mxu1 %v785_v50 }
 0x18c   : > { %v1520_v54 = vpop.f32.mrb[19].mxu0  ;;  %1053 = vmatprep.mubr.bf16.mxu1 %v1738_v48 }
 0x18d   : > { %v1521_v55 = vadd.f32 %v1520_v54, %v1519_v53  ;;  %v774_v58 = vmul.f32 %v1518_v52, %v729_v56 }
 0x18f   : > { %v775_v59 = vmul.f32 %v1521_v55, %v734_v57 }
 0x191   : > { %v1522_v61 = vpop.f32.mrb[20].mxu0  ;;  %v786_v62 = vpack.c.bf16 %v775_v59, %v774_v58 }
 0x192   : > { %v1523_v63 = vpop.f32.mrb[21].mxu0 }
 0x193   : > { %v1524_v0 = vadd.f32 %v1523_v63, %v1522_v61  ;;  %v1525_v1 = vpop.f32.mrb[22].mxu0  ;;  %1054 = vmatmul.mubr.bf16.gmra.mrb[16].mxu1 %v786_v62 }
 0x194   : > { %v1526_v2 = vpop.f32.mrb[23].mxu0  ;;  %1061 = vmatprep.mubr.bf16.mxu1 %v1739_v60 }
 0x195   : > { %v1527_v3 = vadd.f32 %v1526_v2, %v1525_v1  ;;  %v776_v6 = vmul.f32 %v1524_v0, %v739_v4 }
 0x197   : > { %v777_v7 = vmul.f32 %v1527_v3, %v744_v5 }
 0x199   : > { %v1528_v9 = vpop.f32.mrb[24].mxu0  ;;  %v787_v10 = vpack.c.bf16 %v777_v7, %v776_v6 }
 0x19a   : > { %v1529_v11 = vpop.f32.mrb[25].mxu0 }
 0x19b   : > { %v1530_v12 = vadd.f32 %v1529_v11, %v1528_v9  ;;  %v1531_v13 = vpop.f32.mrb[26].mxu0  ;;  %1062 = vmatmul.mubr.bf16.gmra.mrb[20].mxu1 %v787_v10 }
 0x19c   : > { %v1532_v14 = vpop.f32.mrb[27].mxu0  ;;  %1069 = vmatprep.mubr.bf16.mxu1 %v1740_v8 }
 0x19d   : > { %v1533_v15 = vadd.f32 %v1532_v14, %v1531_v13  ;;  %v778_v18 = vmul.f32 %v1530_v12, %v749_v16 }
 0x19f   : > { %v779_v19 = vmul.f32 %v1533_v15, %v754_v17 }
 0x1a1   : > { %v1534_v21 = vpop.f32.mrb[28].mxu0  ;;  %v788_v22 = vpack.c.bf16 %v779_v19, %v778_v18 }
 0x1a2   : > { %v1535_v23 = vpop.f32.mrb[29].mxu0 }
 0x1a3   : > { %v1536_v24 = vadd.f32 %v1535_v23, %v1534_v21  ;;  %v1537_v25 = vpop.f32.mrb[30].mxu0  ;;  %1070 = vmatmul.mubr.bf16.gmra.mrb[24].mxu1 %v788_v22 }
 0x1a4   : > { %v1538_v26 = vpop.f32.mrb[31].mxu0  ;;  %1077 = vmatprep.mubr.bf16.mxu1 %v1741_v20 }
 0x1a5   : > { %v1539_v27 = vadd.f32 %v1538_v26, %v1537_v25  ;;  %v780_v30 = vmul.f32 %v1536_v24, %v759_v28 }
 0x1a7   : > { %v781_v31 = vmul.f32 %v1539_v27, %v764_v29 }
 0x1a9   : > { %v789_v32 = vpack.c.bf16 %v781_v31, %v780_v30 }
 0x1ab   : > { %1078 = vmatmul.mubr.bf16.gmra.mrb[28].mxu1 %v789_v32 }
 0x246   : > { %v1556_v33 = vpop.f32.mrb[0].mxu1 }
 0x247   : > { %v1557_v35 = vpop.f32.mrb[1].mxu1 }
 0x248   : > { %v1558_v36 = vadd.f32 %v1557_v35, %v1556_v33  ;;  %v1559_v37 = vpop.f32.mrb[2].mxu1 }
 0x249   : > { %v1560_v38 = vpop.f32.mrb[3].mxu1 }
 0x24a   : > { %v1024_v39 = vadd.f32 %v1558_v36, %v2196_v34  ;;  %v1561_v40 = vadd.f32 %v1560_v38, %v1559_v37 }
 0x24c   : > { %v1027_v41 = vadd.f32 %v1561_v40, %v2196_v34  ;;  %v1086_v42 = vmax.f32 %v1024_v39, 0.0 }
 0x24e   : > { %v1087_v43 = vmax.f32 %v1027_v41, 0.0  ;;  %v1562_v44 = vpop.f32.mrb[4].mxu1 }
 0x24f   : > { %v1563_v45 = vpop.f32.mrb[5].mxu1 }
 0x250   : > { %v1432_v46 = vpack.c.bf16 %v1087_v43, %v1086_v42  ;;  %v1564_v47 = vadd.f32 %v1563_v45, %v1562_v44  ;;  %v1565_v48 = vpop.f32.mrb[6].mxu1 }
 0x251   : > { %v1566_v49 = vpop.f32.mrb[7].mxu1 }
 0x252   : > { %1433 = vst [vmem:[%s2201_s16] sm:$0xff] %v1432_v46   ;;  %v1032_v50 = vadd.f32 %v1564_v47, %v2196_v34  ;;  %v1567_v51 = vadd.f32 %v1566_v49, %v1565_v48 }
 0x254   : > { %v1035_v52 = vadd.f32 %v1567_v51, %v2196_v34  ;;  %v1088_v53 = vmax.f32 %v1032_v50, 0.0 }
 0x256   : > { %v1089_v54 = vmax.f32 %v1035_v52, 0.0  ;;  %v1568_v55 = vpop.f32.mrb[8].mxu1 }
 0x257   : > { %v1569_v56 = vpop.f32.mrb[9].mxu1 }
 0x258   : > { %v1437_v57 = vpack.c.bf16 %v1089_v54, %v1088_v53  ;;  %v1570_v58 = vadd.f32 %v1569_v56, %v1568_v55  ;;  %v1571_v59 = vpop.f32.mrb[10].mxu1 }
 0x259   : > { %v1572_v60 = vpop.f32.mrb[11].mxu1 }
 0x25a   : > { %1469 = vst [vmem:[%s2201_s16 + $0x8] sm:$0xff] %v1437_v57   ;;  %v1040_v61 = vadd.f32 %v1570_v58, %v2196_v34  ;;  %v1573_v62 = vadd.f32 %v1572_v60, %v1571_v59 }
 0x25c   : > { %v1043_v63 = vadd.f32 %v1573_v62, %v2196_v34  ;;  %v1090_v0 = vmax.f32 %v1040_v61, 0.0 }
 0x25e   : > { %v1091_v1 = vmax.f32 %v1043_v63, 0.0  ;;  %v1574_v2 = vpop.f32.mrb[12].mxu1 }
 0x25f   : > { %v1575_v3 = vpop.f32.mrb[13].mxu1 }
 0x260   : > { %v1442_v4 = vpack.c.bf16 %v1091_v1, %v1090_v0  ;;  %v1576_v5 = vadd.f32 %v1575_v3, %v1574_v2  ;;  %v1577_v6 = vpop.f32.mrb[14].mxu1 }
 0x261   : > { %v1578_v7 = vpop.f32.mrb[15].mxu1 }
 0x262   : > { %1470 = vst [vmem:[%s2201_s16 + $0x10] sm:$0xff] %v1442_v4   ;;  %v1048_v8 = vadd.f32 %v1576_v5, %v2196_v34  ;;  %v1579_v9 = vadd.f32 %v1578_v7, %v1577_v6 }
 0x264   : > { %v1051_v10 = vadd.f32 %v1579_v9, %v2196_v34  ;;  %v1092_v11 = vmax.f32 %v1048_v8, 0.0 }
 0x266   : > { %v1093_v12 = vmax.f32 %v1051_v10, 0.0  ;;  %v1580_v13 = vpop.f32.mrb[16].mxu1 }
 0x267   : > { %v1581_v14 = vpop.f32.mrb[17].mxu1 }
 0x268   : > { %v1447_v15 = vpack.c.bf16 %v1093_v12, %v1092_v11  ;;  %v1582_v16 = vadd.f32 %v1581_v14, %v1580_v13  ;;  %v1583_v17 = vpop.f32.mrb[18].mxu1 }
 0x269   : > { %v1584_v18 = vpop.f32.mrb[19].mxu1 }
 0x26a   : > { %1471 = vst [vmem:[%s2201_s16 + $0x18] sm:$0xff] %v1447_v15   ;;  %v1056_v19 = vadd.f32 %v1582_v16, %v2196_v34  ;;  %v1585_v20 = vadd.f32 %v1584_v18, %v1583_v17 }
 0x26c   : > { %v1059_v21 = vadd.f32 %v1585_v20, %v2196_v34  ;;  %v1094_v22 = vmax.f32 %v1056_v19, 0.0 }
 0x26e   : > { %v1095_v23 = vmax.f32 %v1059_v21, 0.0  ;;  %v1586_v24 = vpop.f32.mrb[20].mxu1 }
 0x26f   : > { %v1587_v25 = vpop.f32.mrb[21].mxu1 }
 0x270   : > { %v1452_v26 = vpack.c.bf16 %v1095_v23, %v1094_v22  ;;  %v1588_v27 = vadd.f32 %v1587_v25, %v1586_v24  ;;  %v1589_v28 = vpop.f32.mrb[22].mxu1 }
 0x271   : > { %v1590_v29 = vpop.f32.mrb[23].mxu1 }
 0x272   : > { %1472 = vst [vmem:[%s2201_s16 + $0x20] sm:$0xff] %v1452_v26   ;;  %v1064_v30 = vadd.f32 %v1588_v27, %v2196_v34  ;;  %v1591_v31 = vadd.f32 %v1590_v29, %v1589_v28 }
 0x274   : > { %v1067_v32 = vadd.f32 %v1591_v31, %v2196_v34  ;;  %v1096_v33 = vmax.f32 %v1064_v30, 0.0 }
 0x276   : > { %v1097_v35 = vmax.f32 %v1067_v32, 0.0  ;;  %v1592_v36 = vpop.f32.mrb[24].mxu1 }
 0x277   : > { %v1593_v37 = vpop.f32.mrb[25].mxu1 }
 0x278   : > { %v1457_v38 = vpack.c.bf16 %v1097_v35, %v1096_v33  ;;  %v1594_v39 = vadd.f32 %v1593_v37, %v1592_v36  ;;  %v1595_v40 = vpop.f32.mrb[26].mxu1 }
 0x279   : > { %v1596_v41 = vpop.f32.mrb[27].mxu1 }
 0x27a   : > { %1473 = vst [vmem:[%s2201_s16 + $0x28] sm:$0xff] %v1457_v38   ;;  %v1072_v42 = vadd.f32 %v1594_v39, %v2196_v34  ;;  %v1597_v43 = vadd.f32 %v1596_v41, %v1595_v40 }
 0x27c   : > { %v1075_v44 = vadd.f32 %v1597_v43, %v2196_v34  ;;  %v1098_v45 = vmax.f32 %v1072_v42, 0.0 }
 0x27e   : > { %v1099_v46 = vmax.f32 %v1075_v44, 0.0  ;;  %v1598_v47 = vpop.f32.mrb[28].mxu1 }
 0x27f   : > { %v1599_v48 = vpop.f32.mrb[29].mxu1 }
 0x280   : > { %v1462_v49 = vpack.c.bf16 %v1099_v46, %v1098_v45  ;;  %v1600_v50 = vadd.f32 %v1599_v48, %v1598_v47  ;;  %v1601_v51 = vpop.f32.mrb[30].mxu1 }
 0x281   : > { %v1602_v52 = vpop.f32.mrb[31].mxu1 }
 0x282   : > { %1474 = vst [vmem:[%s2201_s16 + $0x30] sm:$0xff] %v1462_v49   ;;  %v1080_v53 = vadd.f32 %v1600_v50, %v2196_v34  ;;  %v1603_v54 = vadd.f32 %v1602_v52, %v1601_v51 }
 0x284   : > { %v1083_v55 = vadd.f32 %v1603_v54, %v2196_v34  ;;  %v1100_v56 = vmax.f32 %v1080_v53, 0.0 }
 0x286   : > { %v1101_v57 = vmax.f32 %v1083_v55, 0.0 }
 0x288   : > { %v1467_v58 = vpack.c.bf16 %v1101_v57, %v1100_v56 }
 0x28a   : > { %1475 = vst [vmem:[%s2201_s16 + $0x38] sm:$0xff] %v1467_v58  }
 0x28b   : > { %1841 = shalt.err (!%p1838_p3)
}
 0x28c   : > { %s1842_s28 = scalar_lea.hbm %s2229_s11, 1024  ;;  %s1846_s29 = scalar_lea.hbm %s2284_s6, 2048 }
 0x28d   : > { %p1843_p11 = scmp.ne.s32.totalorder %s2229_s11, %s1842_s28  ;;  %p1847_p8 = scmp.lt.u32.totalorder %s2229_s11, %s2284_s6 }
 0x28e   : > { %p1848_p9 = scmp.lt.u32.totalorder %s1846_s29, %s1842_s28  ;;  %p1850_p1 = scmp.lt.u32.totalorder %s1842_s28, %s2229_s11 }
 0x28f   : > { %p1844_p0 = pnand %p1843_p11, %p2309_p4 }
 0x290   : > { %p1849_p10 = por %p1848_p9, %p1847_p8 }
 0x291   : > { %p1845_p7 = pneg %p1844_p0 }
 0x292   : > { %p1851_p2 = por %p1850_p1, %p1849_p10 }
 0x294   : > { %p1852_p6 = pnand %p1851_p2, %p1845_p7 }
 0x296   : > { %1855 = shalt.err (!%p1852_p6)
}
 0x297   : > { %s1911_s16 = smov 64   ;;  %s1912_s20 = smov 4  }
 0x298   : > { %1614 = dma.vmem_to_hbm [thread:$0]  (%p2309_p4), %s2231_s12, 1024, %s2229_s11, %s2236_s8, %s1911_s16, %s1911_s16, %s1912_s20  }
 0x299 PF: > { %s1211_s17 = sand.u32 1, %s1890_s21   ;;  %p2310_p5 = scmp.ne.s32.totalorder %s2295_s10, 0 }
 0x29a   : > { %p2311_p12 = scmp.ge.s32.totalorder %s1902_s24, 2  ;;  %s1212_s14 = scalar_lea.sflag [#allocation4], %s1211_s17 }
 0x29c   : > { %p1628_p13 = pnand %p2311_p12, %p2310_p5 }
 0x29e   : > { %1885 = dma.done.wait (!%p1628_p13), %s1212_s14, 1024  }
 0x29f   : > { %1887 = vsyncadd (!%p1628_p13), %s1212_s14, 4294966272  ;;  %s2312_s30 = sld [smem:[#allocation13_spill]]  ;;  %p20_p3 = scmp.ge.s32.totalorder %s1973_s27, 4  }
 0x2a0   : > { %s2313_s21 = smov %s1894_s22  ;;  %s2314_s22 = smov %s1898_s23 }
 0x2a1   : > { %s2316_s24 = smov %s1973_s27  ;;  %22 = sbr.rel (!%p20_p3) target bundleno = 6 (0x6), region = 104 }
 0x2a5   : > { %s2315_s23 = smov %s2312_s30 }
 0x2a8   :  { %1217 = vsyncpa [#allocation3], 1 }
 0x2a9   :  { %1219 = vsyncpa [#allocation3 + $0x1], 1 }
 0x2aa   :  { %1220 = vsyncpa [#allocation6], 1 }
 0x2ab   :  { %1222 = vsyncpa [#allocation6 + $0x1], 1 }
 0x2ac   :  { %1223 = vsyncpa [#allocation4], 1 }
 0x2ad   :  { %1225 = vsyncpa [#allocation4 + $0x1], 1 }

</bundles_post_ra>
